<compile_context>
chip_gen: v7x
topology: tpu7x:2x2x1
jax: 0.10.0
libtpu: 0.0.40
codegen_flags: <defaults>
</compile_context>

<pallas_src>
import functools

import jax
import jax.numpy as jnp
from jax import lax
from jax.experimental import pallas as pl
from jax.experimental.pallas import tpu as pltpu

LANES = 128
ACC_ROW_CANDIDATES = (64, 32, 16, 8)   # accumulator heights, best (most ILP) first


def _sublane_pack(dtype):
    """Sublane packing of the TPU vreg tile for this dtype (8 f32 / 16 bf16 / 32 i8)."""
    return max(8, 32 // jnp.dtype(dtype).itemsize)


def _chip_config():
    """(num_splits, max_block_rows, vmem_limit_bytes) tuned per TPU generation."""
    try:
        kind = jax.devices()[0].device_kind.lower()
    except Exception:
        kind = ""
    if "v7" in kind:
        # 2 TCs/chip, 64 MiB VMEM/TC, ~3.2 TB/s HBM: 2 MiB/input blocks amortize the
        # ~0.35us/step overhead; 2-way parallel split so both TensorCores stream.
        return 2, 4096, 48 * 1024 * 1024
    if "v6" in kind:
        # 1 TC, 128 MiB VMEM: go bigger; an explicit split would just be a serial loop.
        return 1, 8192, 64 * 1024 * 1024
    if "v5p" in kind or "v4" in kind:
        return 1, 4096, 48 * 1024 * 1024
    # v5e / unknown: ~820 GB/s HBM means 2048-row blocks already hide per-step overhead.
    return 1, 2048, 32 * 1024 * 1024


def _wmse_kernel(p_ref, t_ref, w_ref, o_ref, acc_ref, *,
                 rows, block_rows, blocks, full_blocks, blocks_per_split,
                 padded_blocks, inv_n, size_average):
    i = pl.program_id(1)                      # sequential block index inside this split

    @pl.when(i == 0)
    def _init():
        acc_ref[...] = jnp.zeros_like(acc_ref)

    p = p_ref[...].astype(jnp.float32)
    t = t_ref[...].astype(jnp.float32)
    w = w_ref[...].astype(jnp.float32)
    d = t - p
    val = w * d * d

    acc_rows = acc_ref.shape[0]

    def fold(x):
        # (block_rows, 128) -> (acc_rows, 128): pure VPU adds into acc_rows//8
        # independent vreg chains; the cross-lane reduce happens only in finalize.
        if block_rows == acc_rows:
            return x
        return jnp.sum(x.reshape(block_rows // acc_rows, acc_rows, LANES), axis=0)

    if full_blocks == padded_blocks:
        # Common case: every grid step is a full, real block -> no mask, no clamp.
        acc_ref[...] += fold(val)
    else:
        logical_block = pl.program_id(0) * blocks_per_split + i

        @pl.when(logical_block < full_blocks)
        def _full():
            acc_ref[...] += fold(val)

        if full_blocks < blocks:
            # Exactly one partial tail block exists; only there do we pay for the
            # iota/compare/select (its overhang contents are unspecified).
            @pl.when(logical_block == full_blocks)
            def _tail():
                row_ids = lax.broadcasted_iota(jnp.int32, (block_rows, LANES), 0)
                in_range = full_blocks * block_rows + row_ids < rows
                acc_ref[...] += fold(jnp.where(in_range, val, 0.0))
        # logical_block >= blocks: clamped redundant re-read -> skipped entirely.

    @pl.when(i == pl.num_programs(1) - 1)
    def _finalize():
        total = jnp.sum(acc_ref[...])          # single XLU reduce per split
        if size_average:
            total = total * jnp.float32(inv_n)
        o_ref[0, 0] = total


def weighted_mse(pred, truth, weights, size_average=True):
    """Pallas TPU implementation of Weighted_MSE.forward."""
    assert pred.shape == truth.shape == weights.shape
    n = int(pred.size)
    assert n > 0

    chip_splits, max_block_rows, vmem_limit = _chip_config()

    # Pad the flattened tensors to the widest dtype tile among the inputs so every
    # BlockSpec satisfies its (pack, 128) divisibility constraint.
    pack = max(_sublane_pack(x.dtype) for x in (pred, truth, weights))
    chunk = pack * LANES
    n_pad = pl.cdiv(n, chunk) * chunk

    def prep(x):
        x = jnp.ravel(x)
        if n_pad != n:                          # pad only when needed
            x = jnp.pad(x, (0, n_pad - n))      # zero weights -> padding adds 0
        return x.reshape(n_pad // LANES, LANES)

    p2, t2, w2 = prep(pred), prep(truth), prep(weights)

    rows = n_pad // LANES                       # multiple of `pack`
    block_rows = min(max_block_rows, rows)      # multiple of `pack` (or the full dim)
    blocks = pl.cdiv(rows, block_rows)
    full_blocks = rows // block_rows            # blocks fully inside the real rows
    num_splits = chip_splits if blocks >= chip_splits else 1
    blocks_per_split = pl.cdiv(blocks, num_splits)
    padded_blocks = num_splits * blocks_per_split
    acc_rows = max(r for r in ACC_ROW_CANDIDATES if block_rows % r == 0)

    def in_map(c, i):
        b = c * blocks_per_split + i
        if padded_blocks != blocks:
            # Redundant trailing steps re-read a valid block (skipped in-kernel),
            # so no out-of-range block index is ever issued.
            b = jnp.minimum(b, blocks - 1)
        return (b, 0)

    kernel = functools.partial(
        _wmse_kernel,
        rows=rows, block_rows=block_rows, blocks=blocks,
        full_blocks=full_blocks, blocks_per_split=blocks_per_split,
        padded_blocks=padded_blocks, inv_n=1.0 / float(n),
        size_average=size_average,
    )

    bytes_accessed = (sum(x.dtype.itemsize for x in (pred, truth, weights)) * n
                      + 4 * num_splits)
    cost = pl.CostEstimate(flops=3 * n, transcendentals=0,
                           bytes_accessed=bytes_accessed)

    partials = pl.pallas_call(
        kernel,
        out_shape=jax.ShapeDtypeStruct((num_splits, 1), jnp.float32),
        grid_spec=pltpu.PrefetchScalarGridSpec(
            num_scalar_prefetch=0,
            grid=(num_splits, blocks_per_split),
            in_specs=[
                pl.BlockSpec((block_rows, LANES), in_map),
                pl.BlockSpec((block_rows, LANES), in_map),
                pl.BlockSpec((block_rows, LANES), in_map),
            ],
            out_specs=pl.BlockSpec((1, 1), lambda c, i: (c, 0),
                                   memory_space=pltpu.SMEM),
            scratch_shapes=[pltpu.VMEM((acc_rows, LANES), jnp.float32)],
        ),
        compiler_params=pltpu.CompilerParams(
            dimension_semantics=("parallel", "arbitrary"),
            vmem_limit_bytes=vmem_limit,
        ),
        cost_estimate=cost,
    )(p2, t2, w2)

    # Each split's partial already carries the 1/n factor when size_average;
    # summing the (num_splits, 1) partials finishes the reduction.
    return jnp.sum(partials)


if __name__ == "__main__":
    root = jax.random.PRNGKey(0)

    def make_inputs(k, shape, dtype=jnp.float32):
        k1, k2, k3 = jax.random.split(k, 3)
        pred = jax.random.normal(k1, shape, dtype=jnp.float32).astype(dtype)
        truth = jax.random.normal(k2, shape, dtype=jnp.float32).astype(dtype)
        weights = jax.random.uniform(k3, shape, dtype=jnp.float32).astype(dtype)
        return pred, truth, weights

    def ref_loss(pred, truth, weights, size_average=True):
        p = pred.astype(jnp.float32)
        t = truth.astype(jnp.float32)
        w = weights.astype(jnp.float32)
        v = w * (t - p) ** 2
        return jnp.mean(v) if size_average else jnp.sum(v)

    # 1) Small (batch, channels, H, W) prediction — single-block path, mean and sum.
    pred, truth, weights = make_inputs(jax.random.fold_in(root, 0), (2, 4, 16, 16))
    loss = jax.block_until_ready(weighted_mse(pred, truth, weights, size_average=True))
    assert jnp.allclose(loss, ref_loss(pred, truth, weights, True),
                        rtol=1e-5, atol=1e-6), loss
    loss_sum = jax.block_until_ready(
        weighted_mse(pred, truth, weights, size_average=False))
    assert jnp.allclose(loss_sum, ref_loss(pred, truth, weights, False),
                        rtol=1e-5, atol=1e-3), loss_sum

    # 2) Numel not a multiple of the dtype tile — exercises zero-weight padding.
    pred, truth, weights = make_inputs(jax.random.fold_in(root, 1), (3, 5, 7, 11))
    loss = jax.block_until_ready(weighted_mse(pred, truth, weights))
    assert jnp.allclose(loss, ref_loss(pred, truth, weights),
                        rtol=1e-5, atol=1e-6), loss

    # 3) Larger tensor — multi-block streaming; on chips where the block count does
    #    not divide evenly it also exercises the gated tail-mask / skip paths.
    pred, truth, weights = make_inputs(jax.random.fold_in(root, 2), (10, 16, 64, 64))
    loss = jax.block_until_ready(weighted_mse(pred, truth, weights))
    assert jnp.allclose(loss, ref_loss(pred, truth, weights),
                        rtol=1e-4, atol=1e-6), loss

    # 4) bf16 inputs — exercises the dtype-derived (16, 128) tile alignment and the
    #    in-kernel cast to f32.
    pred, truth, weights = make_inputs(jax.random.fold_in(root, 3), (6, 3, 33, 33),
                                       dtype=jnp.bfloat16)
    loss = jax.block_until_ready(weighted_mse(pred, truth, weights))
    assert jnp.allclose(loss, ref_loss(pred, truth, weights),
                        rtol=1e-4, atol=1e-6), loss

    print("KERNEL_OK")
</pallas_src>

<mosaic_0001>
module attributes {stable_mosaic.version = 11 : i64} {
  func.func @_wmse_kernel(%arg0: i32, %arg1: i32, %arg2: memref<16x128xf32, #tpu.memory_space<vmem>>, %arg3: memref<16x128xf32, #tpu.memory_space<vmem>>, %arg4: memref<16x128xf32, #tpu.memory_space<vmem>>, %arg5: memref<1x1xf32, #tpu.memory_space<smem>>, %arg6: memref<16x128xf32, #tpu.memory_space<vmem>>) attributes {dimension_semantics = [#tpu.dimension_semantics<parallel>, #tpu.dimension_semantics<arbitrary>], iteration_bounds = array<i64: 1, 1>, scalar_prefetch = 0 : i64, scratch_operands = 1 : i64, tpu.core_type = #tpu.core_type<tc>, window_params = [{transform_indices = @transform_0, window_bounds = array<i64: 16, 128>}, {transform_indices = @transform_1, window_bounds = array<i64: 16, 128>}, {transform_indices = @transform_2, window_bounds = array<i64: 16, 128>}, {transform_indices = @transform_3, window_bounds = array<i64: 1, 1>}]} {
    %c0_i32 = arith.constant 0 : i32
    %0 = arith.cmpi eq, %arg1, %c0_i32 : i32
    %1 = arith.extui %0 : i1 to i32
    %c0_i32_0 = arith.constant 0 : i32
    %2 = arith.cmpi ne, %1, %c0_i32_0 : i32
    scf.if %2 {
      %cst = arith.constant 0.000000e+00 : f32
      %15 = vector.broadcast %cst : f32 to vector<16x128xf32>
      %c0_12 = arith.constant 0 : index
      %c0_13 = arith.constant 0 : index
      %16 = vector.load %arg6[%c0_12, %c0_13] : memref<16x128xf32, #tpu.memory_space<vmem>>, vector<16x128xf32>
      tpu.vector_store %arg6[%c0_12, %c0_13], %15 {strides = array<i32>} : memref<16x128xf32, #tpu.memory_space<vmem>>, vector<16x128xf32>,
    } else {
    }
    %c0 = arith.constant 0 : index
    %c0_1 = arith.constant 0 : index
    %3 = vector.load %arg2[%c0, %c0_1] : memref<16x128xf32, #tpu.memory_space<vmem>>, vector<16x128xf32>
    %c0_2 = arith.constant 0 : index
    %c0_3 = arith.constant 0 : index
    %4 = vector.load %arg3[%c0_2, %c0_3] : memref<16x128xf32, #tpu.memory_space<vmem>>, vector<16x128xf32>
    %c0_4 = arith.constant 0 : index
    %c0_5 = arith.constant 0 : index
    %5 = vector.load %arg4[%c0_4, %c0_5] : memref<16x128xf32, #tpu.memory_space<vmem>>, vector<16x128xf32>
    %6 = arith.subf %4, %3 : vector<16x128xf32>
    %7 = arith.mulf %5, %6 : vector<16x128xf32>
    %8 = arith.mulf %7, %6 : vector<16x128xf32>
    %c0_6 = arith.constant 0 : index
    %c0_7 = arith.constant 0 : index
    %9 = vector.load %arg6[%c0_6, %c0_7] : memref<16x128xf32, #tpu.memory_space<vmem>>, vector<16x128xf32>
    %10 = arith.addf %9, %8 : vector<16x128xf32>
    %c0_8 = arith.constant 0 : index
    %c0_9 = arith.constant 0 : index
    %11 = vector.load %arg6[%c0_8, %c0_9] : memref<16x128xf32, #tpu.memory_space<vmem>>, vector<16x128xf32>
    tpu.vector_store %arg6[%c0_8, %c0_9], %10 {strides = array<i32>} : memref<16x128xf32, #tpu.memory_space<vmem>>, vector<16x128xf32>,
    %c0_i32_10 = arith.constant 0 : i32
    %12 = arith.cmpi eq, %arg1, %c0_i32_10 : i32
    %13 = arith.extui %12 : i1 to i32
    %c0_i32_11 = arith.constant 0 : i32
    %14 = arith.cmpi ne, %13, %c0_i32_11 : i32
    scf.if %14 {
      %c0_12 = arith.constant 0 : index
      %c0_13 = arith.constant 0 : index
      %15 = vector.load %arg6[%c0_12, %c0_13] : memref<16x128xf32, #tpu.memory_space<vmem>>, vector<16x128xf32>
      %16 = vector.shape_cast %15 : vector<16x128xf32> to vector<1x16x128xf32>
      %cst = arith.constant dense<0.000000e+00> : vector<1xf32>
      %17 = vector.multi_reduction <add>, %16, %cst [1, 2] : vector<1x16x128xf32> to vector<1xf32>
      %18 = vector.shape_cast %17 : vector<1xf32> to vector<1x1x1xf32>
      %19 = vector.extract %18[0, 0, 0] : f32 from vector<1x1x1xf32>
      %cst_14 = arith.constant 4.8828125E-4 : f32
      %20 = arith.mulf %19, %cst_14 : f32
      %c0_15 = arith.constant 0 : index
      %c0_16 = arith.constant 0 : index
      %21 = memref.load %arg5[%c0_15, %c0_16] : memref<1x1xf32, #tpu.memory_space<smem>>
      memref.store %20, %arg5[%c0_15, %c0_16] : memref<1x1xf32, #tpu.memory_space<smem>>
    } else {
    }
    return
  }
  func.func @transform_0(%arg0: i32, %arg1: i32) -> (i32, i32) {
    %c1_i32 = arith.constant 1 : i32
    %0 = arith.muli %arg0, %c1_i32 : i32
    %1 = arith.addi %0, %arg1 : i32
    %c0_i32 = arith.constant 0 : i32
    %c0_i32_0 = arith.constant 0 : i32
    return %1, %c0_i32 : i32, i32
  }
  func.func @transform_1(%arg0: i32, %arg1: i32) -> (i32, i32) {
    %c1_i32 = arith.constant 1 : i32
    %0 = arith.muli %arg0, %c1_i32 : i32
    %1 = arith.addi %0, %arg1 : i32
    %c0_i32 = arith.constant 0 : i32
    %c0_i32_0 = arith.constant 0 : i32
    return %1, %c0_i32 : i32, i32
  }
  func.func @transform_2(%arg0: i32, %arg1: i32) -> (i32, i32) {
    %c1_i32 = arith.constant 1 : i32
    %0 = arith.muli %arg0, %c1_i32 : i32
    %1 = arith.addi %0, %arg1 : i32
    %c0_i32 = arith.constant 0 : i32
    %c0_i32_0 = arith.constant 0 : i32
    return %1, %c0_i32 : i32, i32
  }
  func.func @transform_3(%arg0: i32, %arg1: i32) -> (i32, i32) {
    %c0_i32 = arith.constant 0 : i32
    %c0_i32_0 = arith.constant 0 : i32
    return %arg0, %c0_i32 : i32, i32
  }
}

</mosaic_0001>

<bundles_post_ra>
// kernel: tpu_custom_call.1
= control target key start
LH: loop header
LB: loop body
LE: loop exit
PB: predicated region body
PF: predicated region fallthrough
CT: control target
= control target key end

     0   :  { %8 = vsyncpa [#allocation4], 0  ;;  %s311_s0 = inlined_call_operand.hbm [shape: f32[16,128], index: 0, kind: input, shape index: {}]   ;;  %s312_s1 = inlined_call_operand.hbm [shape: f32[16,128], index: 1, kind: input, shape index: {}]   ;;  %s313_s2 = inlined_call_operand.hbm [shape: f32[16,128], index: 2, kind: input, shape index: {}]   ;;  %s314_s3 = inlined_call_operand.hbm [shape: f32[1,1], index: 3, kind: output, shape index: {}]  }
   0x1   :  { %9 = vsyncpa [#allocation7], 0 }
   0x2   :  { %10 = vsyncpa [#allocation5], 0  ;;  %s221_s12 = smov [#allocation6]   ;;  %s222_s14 = smov [#allocation3]  }
   0x3   :  { %s36_s13 = sshll.u32 %s221_s12, 4  ;;  %s20_s15 = sshll.u32 %s222_s14, 4  ;;  %s37_s13 = int_to_ptr.vmem [resolvable:$true] %s36_s13  ;;  %s247_s15 = int_to_ptr.vmem [resolvable:$true] %s20_s15 }
   0x4   :  { %s139_s18 = scalar_lea.hbm %s312_s1, 256 }
   0x5   :  { %p140_p0 = scmp.ne.s32.totalorder %s312_s1, %s139_s18  ;;  %p143_p1 = scmp.lt.u32.totalorder %s139_s18, %s312_s1 }
   0x7   :  { %p145_p2 = pnand %p143_p1, %p140_p0 }
   0x9   :  { %148 = shalt.err (!%p145_p2)
}
   0xa   :  { %s149_s23 = scalar_lea.vmem %s37_s13, 256  ;;  %p154_p4 = scmp.lt.s32.totalorder %s37_s13, %s37_s13 }
   0xb   :  { %p150_p3 = scmp.ne.s32.totalorder %s37_s13, %s149_s23  ;;  %p155_p5 = scmp.lt.s32.totalorder %s149_s23, %s149_s23 }
   0xd   :  { %p156_p6 = por %p155_p5, %p154_p4 }
   0xf   :  { %p157_p7 = pnand %p156_p6, %p150_p3 }
  0x11   :  { %160 = shalt.err (!%p157_p7)
}
  0x12   :  { %s223_s24 = smov 128   ;;  %s224_s25 = smov 8  }
  0x13   :  { %42 = dma.hbm_to_vmem [thread:$0]  %s312_s1, 256, %s37_s13, [#allocation7], %s223_s24, %s223_s24, %s224_s25  }
  0x14   :  { %s161_s30 = scalar_lea.hbm %s311_s0, 256 }
  0x15   :  { %p162_p8 = scmp.ne.s32.totalorder %s311_s0, %s161_s30  ;;  %p165_p9 = scmp.lt.u32.totalorder %s161_s30, %s311_s0 }
  0x17   :  { %p167_p10 = pnand %p165_p9, %p162_p8 }
  0x19   :  { %170 = shalt.err (!%p167_p10)
}
  0x1a   :  { %s171_s8 = scalar_lea.vmem %s247_s15, 256  ;;  %p176_p12 = scmp.lt.s32.totalorder %s247_s15, %s247_s15 }
  0x1b   :  { %p172_p11 = scmp.ne.s32.totalorder %s247_s15, %s171_s8  ;;  %p177_p13 = scmp.lt.s32.totalorder %s171_s8, %s171_s8 }
  0x1d   :  { %p178_p0 = por %p177_p13, %p176_p12 }
  0x1f   :  { %p179_p1 = pnand %p178_p0, %p172_p11 }
  0x21   :  { %182 = shalt.err (!%p179_p1)
}
  0x22   :  { %26 = dma.hbm_to_vmem [thread:$0]  %s311_s0, 256, %s247_s15, [#allocation4], %s223_s24, %s223_s24, %s224_s25  }
  0x23   :  { %s225_s10 = smov [#allocation8]   ;;  %s183_s14 = scalar_lea.hbm %s313_s2, 256 }
  0x24   :  { %s52_s11 = sshll.u32 %s225_s10, 4  ;;  %p184_p2 = scmp.ne.s32.totalorder %s313_s2, %s183_s14  ;;  %s53_s11 = int_to_ptr.vmem [resolvable:$true] %s52_s11 }
  0x25   :  { %p187_p3 = scmp.lt.u32.totalorder %s183_s14, %s313_s2 }
  0x27   :  { %p189_p4 = pnand %p187_p3, %p184_p2 }
  0x29   :  { %192 = shalt.err (!%p189_p4)
}
  0x2a   :  { %s193_s20 = scalar_lea.vmem %s53_s11, 256  ;;  %p198_p6 = scmp.lt.s32.totalorder %s53_s11, %s53_s11 }
  0x2b   :  { %p194_p5 = scmp.ne.s32.totalorder %s53_s11, %s193_s20  ;;  %p199_p7 = scmp.lt.s32.totalorder %s193_s20, %s193_s20 }
  0x2d   :  { %p200_p8 = por %p199_p7, %p198_p6 }
  0x2f   :  { %p201_p9 = pnand %p200_p8, %p194_p5 }
  0x31   :  { %204 = shalt.err (!%p201_p9)
}
  0x32   :  { %58 = dma.hbm_to_vmem [thread:$0]  %s313_s2, 256, %s53_s11, [#allocation7], %s223_s24, %s223_s24, %s224_s25  }
  0x33   :  { %215 = dma.done.wait [#allocation4], 256  }
  0x34   :  { %216 = vsyncadd [#allocation4], 4294967040 }
  0x35   :  { %217 = dma.done.wait [#allocation7], 512  }
  0x36   :  { %218 = vsyncadd [#allocation7], 4294966784  ;;  %v80_v0 = vld [vmem:[#allocation3] sm:$0xff]  ;;  %v81_v1 = vld [vmem:[#allocation3 + $0x8] sm:$0xff]  ;;  %s205_s24 = scalar_lea.hbm %s314_s3, 16 }
  0x37   :  { %v82_v2 = vld [vmem:[#allocation6] sm:$0xff]  ;;  %v83_v3 = vld [vmem:[#allocation6 + $0x8] sm:$0xff]  ;;  %v84_v4 = vld [vmem:[#allocation8] sm:$0xff]  ;;  %p206_p10 = scmp.ne.s32.totalorder %s314_s3, %s205_s24  ;;  %p209_p11 = scmp.lt.u32.totalorder %s205_s24, %s314_s3 }
  0x38   :  { %v85_v5 = vld [vmem:[#allocation8 + $0x8] sm:$0xff]  ;;  %v86_v6 = vsub.f32 %v82_v2, %v80_v0  ;;  %v87_v7 = vsub.f32 %v83_v3, %v81_v1 }
  0x39   :  { %p211_p12 = pnand %p209_p11, %p206_p10 }
  0x3a   :  { %v88_v8 = vmul.f32 %v86_v6, %v84_v4  ;;  %v89_v9 = vmul.f32 %v87_v7, %v85_v5 }
  0x3c   :  { %v90_v10 = vmul.f32 %v88_v8, %v86_v6  ;;  %v91_v11 = vmul.f32 %v89_v9, %v87_v7 }
  0x3e   :  { %v103_v12 = vadd.f32 %v91_v11, %v90_v10 }
  0x40   :  { %104 = vadd.xlane.f32.xlu0 %v103_v12 }
  0xcd   :  { %v105_v13 = vpop.xlane.xlu0 %104 }
  0xce   :  { %v106_v14 = vrot.slane %v105_v13, 4 }
  0xd0   :  { %v107_v15 = vadd.f32 %v106_v14, %v105_v13 }
  0xd2   :  { %v108_v16 = vrot.slane %v107_v15, 2 }
  0xd4   :  { %v109_v17 = vadd.f32 %v108_v16, %v107_v15 }
  0xd6   :  { %v110_v18 = vrot.slane %v109_v17, 1 }
  0xd8   :  { %v111_v19 = vadd.f32 %v110_v18, %v109_v17 }
  0xda   :  { %131 = vpush %v111_v19 }
 0x10b   :  { %s132_s2 = spop %131 }
 0x10c   :  { %s113_s21 = smul.f32 0.00048828125, %s132_s2 }
 0x10e   :  { %115 = sst [smem:[#allocation9]] %s113_s21 }
 0x10f   :  { %214 = shalt.err (!%p211_p12)
}
 0x110   :  { %s226_s29 = smov [#allocation9]  }
 0x111   :  { %123 = dma.smem_to_hbm %s226_s29, 16, %s314_s3, [#allocation5]  }
 0x112   :  { %219 = dma.done.wait [#allocation5], 16  }
 0x113   :  { %220 = vsyncadd [#allocation5], 4294967280 }
 0x114   :  { %127 = sfence }
 0x115   :  { %128 = vsyncpa [#allocation4], 1 }
 0x116   :  { %129 = vsyncpa [#allocation7], 1 }
 0x117   :  { %130 = vsyncpa [#allocation5], 1 }

</bundles_post_ra>
